<compile_context>
chip_gen: v7x
topology: tpu7x:2x2x1
jax: 0.10.0
libtpu: 0.0.40
codegen_flags: <defaults>
</compile_context>

<pallas_src>
import jax
import jax.numpy as jnp
from jax.experimental import pallas as pl
from jax.experimental.pallas import tpu as pltpu

_LANE = 128   # TPU lane width (last-dim alignment)


def _round_up(n, m):
    return ((n + m - 1) // m) * m


def _pad_to(a, shape):
    pads = [(0, t - s) for s, t in zip(a.shape, shape)]
    if all(p == (0, 0) for p in pads):
        return a
    return jnp.pad(a, pads)


def _vmem_capacity_bytes():
    """Physical VMEM per core; conservative fallback if query is unavailable."""
    try:
        info = pltpu.get_tpu_info()
        cap = getattr(info, "vmem_capacity_bytes", None)
        if cap:
            return int(cap)
    except Exception:
        pass
    return 64 * 1024 * 1024   # v7x per-core size: safe lower bound everywhere


# ----------------------------------------------------------------------------
# Kernel: one batch tile of  y = relu(x @ W1^T + b1) @ W2^T + b2
# ----------------------------------------------------------------------------
def two_layer_net_kernel(x_ref, w1_ref, b1_ref, w2_ref, b2_ref,
                         y_ref, hrelu_ref):
    # In-kernel cast to the MXU dtype (VPU op, hidden under MXU work); the
    # wrapper never touches x.
    x = x_ref[...].astype(w1_ref.dtype)
    h = jnp.dot(x, w1_ref[...], preferred_element_type=jnp.float32)
    h = h + b1_ref[...]                      # f32 bias add
    h_relu = jnp.maximum(h, 0.0)             # f32 ReLU  (== .clamp(min=0))
    hrelu_ref[...] = h_relu.astype(hrelu_ref.dtype)
    y = jnp.dot(h_relu.astype(w2_ref.dtype), w2_ref[...],
                preferred_element_type=jnp.float32)
    y_ref[...] = (y + b2_ref[...]).astype(y_ref.dtype)


# ----------------------------------------------------------------------------
# One-time parameter preparation (transpose / lane-pad / cast) — do this at
# init time, NOT per forward step.
# ----------------------------------------------------------------------------
def prepare_params(w1, b1, w2, b2, *, compute_dtype=jnp.bfloat16,
                   hrelu_dtype=None):
    """w1: [H, D_in], b1: [H], w2: [D_out, H], b2: [D_out] (PyTorch layout)."""
    H, D_in = w1.shape
    D_out, H2 = w2.shape
    assert H2 == H, "w2 second dim must equal H"
    if hrelu_dtype is None:
        hrelu_dtype = compute_dtype

    H_p = _round_up(H, _LANE)
    D_out_p = _round_up(D_out, _LANE)

    w1t = _pad_to(jnp.asarray(w1, jnp.float32).T, (D_in, H_p)).astype(compute_dtype)
    w2t = _pad_to(jnp.asarray(w2, jnp.float32).T, (H_p, D_out_p)).astype(compute_dtype)
    b1r = _pad_to(jnp.asarray(b1, jnp.float32).reshape(1, H), (1, H_p))
    b2r = _pad_to(jnp.asarray(b2, jnp.float32).reshape(1, D_out), (1, D_out_p))

    return dict(w1t=w1t, b1=b1r, w2t=w2t, b2=b2r,
                D_in=D_in, H=H, D_out=D_out,
                compute_dtype=jnp.dtype(compute_dtype),
                hrelu_dtype=jnp.dtype(hrelu_dtype))


# ----------------------------------------------------------------------------
# Forward pass.  Returns (y_pred, h_relu) like the PyTorch module (which
# stashes h_relu in self.hrelu).
# ----------------------------------------------------------------------------
def two_layer_net(x, params, *, batch_tile=512):
    B, D_in = x.shape
    assert D_in == params["D_in"], "x feature dim mismatch"
    w1t, b1, w2t, b2 = params["w1t"], params["b1"], params["w2t"], params["b2"]
    H, D_out = params["H"], params["D_out"]
    H_p, D_out_p = w1t.shape[1], w2t.shape[1]
    cdt, hdt = params["compute_dtype"], params["hrelu_dtype"]

    # ---- batch tiling ----
    sub = 16 if cdt.itemsize <= 2 else 8        # bf16 sublane packing
    tile_b = _round_up(min(B, batch_tile), sub)
    tile_b = min(tile_b, _round_up(B, 8))       # never bigger than (aligned) B

    # ---- per-generation VMEM sizing ----
    cap = _vmem_capacity_bytes()
    budget = int(cap * 0.65)                    # v5e/v6e ~83 MiB, v7x ~42 MiB
    vmem_limit = min(int(cap * 0.85), cap)

    # Resident weights/biases; count 2x since the pipeline may double-buffer
    # even constant-index blocks (we do not force pl.Buffered(1) here).
    w_bytes = 2 * ((D_in * H_p + H_p * D_out_p) * cdt.itemsize
                   + (H_p + D_out_p) * 4)
    if w_bytes > budget:
        # TODO(synk): add an H/D_in-tiled fallback (extra "arbitrary" grid axis
        # with an f32 VMEM accumulator + pl.when init/finalize) so weight
        # matrices larger than VMEM can still run, esp. on v7x's 64 MiB.
        raise ValueError("Weights too large to stay resident in VMEM; "
                         "K/N-tiled fallback not implemented.")

    def _tile_bytes(tb):
        x_db = 2 * tb * D_in * x.dtype.itemsize        # x tile, double-buffered
        y_db = 2 * tb * D_out_p * 4                    # y f32 out, double-buffered
        h_db = 2 * tb * H_p * hdt.itemsize             # h_relu out, double-buffered
        live = 2 * tb * (H_p + D_out_p) * 4            # in-kernel f32 intermediates
        return x_db + y_db + h_db + live

    while tile_b > 8 and w_bytes + _tile_bytes(tile_b) > budget:
        tile_b = max(8, ((tile_b // 2) // 8) * 8)

    # Give v7x's two TensorCores something to split (no-op cost on v5e/v6e).
    if pl.cdiv(B, tile_b) == 1 and tile_b >= 2 * sub and B > tile_b // 2:
        tile_b = _round_up(tile_b // 2, sub)

    grid = (pl.cdiv(B, tile_b),)

    y_p, h_p = pl.pallas_call(
        two_layer_net_kernel,
        out_shape=(
            jax.ShapeDtypeStruct((B, D_out_p), jnp.float32),
            jax.ShapeDtypeStruct((B, H_p), hdt),
        ),
        grid=grid,
        in_specs=[
            pl.BlockSpec((tile_b, D_in), lambda i: (i, 0)),   # x: batch-tiled, stored dtype
            pl.BlockSpec((D_in, H_p), lambda i: (0, 0)),      # W1^T: resident
            pl.BlockSpec((1, H_p), lambda i: (0, 0)),         # b1:   resident (f32)
            pl.BlockSpec((H_p, D_out_p), lambda i: (0, 0)),   # W2^T: resident
            pl.BlockSpec((1, D_out_p), lambda i: (0, 0)),     # b2:   resident (f32)
        ],
        out_specs=(
            pl.BlockSpec((tile_b, D_out_p), lambda i: (i, 0)),
            pl.BlockSpec((tile_b, H_p), lambda i: (i, 0)),
        ),
        compiler_params=pltpu.CompilerParams(
            dimension_semantics=("parallel",),   # megacore split of the batch
            vmem_limit_bytes=vmem_limit,
        ),
    )(x, w1t, b1, w2t, b2)

    # Strip feature-dim padding (no-op when dims are already lane multiples).
    y = y_p if D_out_p == D_out else y_p[:, :D_out]
    h = h_p if H_p == H else h_p[:, :H]
    return y, h


def init_params(key, D_in, H, D_out):
    """Deterministic init mimicking torch.nn.Linear default
    (U[-1/sqrt(fan_in), 1/sqrt(fan_in)])."""
    k1, k2, k3, k4 = jax.random.split(key, 4)
    bound1 = 1.0 / jnp.sqrt(D_in)
    bound2 = 1.0 / jnp.sqrt(H)
    w1 = jax.random.uniform(k1, (H, D_in), jnp.float32, -bound1, bound1)
    b1 = jax.random.uniform(k2, (H,), jnp.float32, -bound1, bound1)
    w2 = jax.random.uniform(k3, (D_out, H), jnp.float32, -bound2, bound2)
    b2 = jax.random.uniform(k4, (D_out,), jnp.float32, -bound2, bound2)
    return w1, b1, w2, b2


if __name__ == "__main__":
    # Small shapes consistent with the module: batch=8, D_in=16, H=32, D_out=8.
    B, D_in, H, D_out = 8, 16, 32, 8

    key = jax.random.PRNGKey(0)
    kx, kp = jax.random.split(key)
    x = jax.random.normal(kx, (B, D_in), jnp.float32)
    w1, b1, w2, b2 = init_params(kp, D_in, H, D_out)

    # Plain-JAX reference (same semantics as the PyTorch forward).
    h_ref = jnp.maximum(x @ w1.T + b1, 0.0)
    y_ref = h_ref @ w2.T + b2

    # Default fast path: bf16 MXU inputs, f32 accumulate, bf16 h_relu store.
    params_bf16 = prepare_params(w1, b1, w2, b2)
    y_bf, h_bf = two_layer_net(x, params_bf16)
    jax.block_until_ready((y_bf, h_bf))
    assert jnp.allclose(y_bf, y_ref, atol=5e-2, rtol=5e-2), "y_pred mismatch (bf16)"
    assert jnp.allclose(h_bf.astype(jnp.float32), h_ref, atol=5e-2, rtol=5e-2), \
        "h_relu mismatch (bf16)"

    # Exact f32 path: bit-comparable to the PyTorch module's numerics.
    params_f32 = prepare_params(w1, b1, w2, b2, compute_dtype=jnp.float32)
    y32, h32 = two_layer_net(x, params_f32)
    jax.block_until_ready((y32, h32))
    assert jnp.allclose(y32, y_ref, atol=1e-5), "y_pred mismatch (f32)"
    assert jnp.allclose(h32, h_ref, atol=1e-5), "h_relu mismatch (f32)"

    print("KERNEL_OK")
</pallas_src>

<mosaic_0001>
module attributes {stable_mosaic.version = 11 : i64} {
  func.func @two_layer_net_kernel(%arg0: i32, %arg1: memref<8x16xf32, #tpu.memory_space<vmem>>, %arg2: memref<16x128xbf16, #tpu.memory_space<vmem>>, %arg3: memref<1x128xf32, #tpu.memory_space<vmem>>, %arg4: memref<128x128xbf16, #tpu.memory_space<vmem>>, %arg5: memref<1x128xf32, #tpu.memory_space<vmem>>, %arg6: memref<8x128xf32, #tpu.memory_space<vmem>>, %arg7: memref<8x128xbf16, #tpu.memory_space<vmem>>) attributes {dimension_semantics = [#tpu.dimension_semantics<parallel>], iteration_bounds = array<i64: 1>, scalar_prefetch = 0 : i64, scratch_operands = 0 : i64, tpu.core_type = #tpu.core_type<tc>, window_params = [{transform_indices = @transform_0, window_bounds = array<i64: 8, 16>}, {pipeline_mode = #tpu.pipeline_mode<synchronous>, transform_indices = @transform_1, window_bounds = array<i64: 16, 128>}, {pipeline_mode = #tpu.pipeline_mode<synchronous>, transform_indices = @transform_2, window_bounds = array<i64: 1, 128>}, {pipeline_mode = #tpu.pipeline_mode<synchronous>, transform_indices = @transform_3, window_bounds = array<i64: 128, 128>}, {pipeline_mode = #tpu.pipeline_mode<synchronous>, transform_indices = @transform_4, window_bounds = array<i64: 1, 128>}, {transform_indices = @transform_5, window_bounds = array<i64: 8, 128>}, {transform_indices = @transform_6, window_bounds = array<i64: 8, 128>}]} {
    %c0 = arith.constant 0 : index
    %c0_0 = arith.constant 0 : index
    %0 = vector.load %arg1[%c0, %c0_0] : memref<8x16xf32, #tpu.memory_space<vmem>>, vector<8x16xf32>
    %1 = arith.truncf %0 : vector<8x16xf32> to vector<8x16xbf16>
    %c0_1 = arith.constant 0 : index
    %c0_2 = arith.constant 0 : index
    %2 = vector.load %arg2[%c0_1, %c0_2] : memref<16x128xbf16, #tpu.memory_space<vmem>>, vector<16x128xbf16>
    %cst = arith.constant dense<0.000000e+00> : vector<8x128xf32>
    %3 = tpu.matmul %1, %2, %cst {dimension_numbers = #tpu.dot_dimension_numbers<[1], [0], [0], [1], [0, 0, 1, 1], [], []>} : vector<8x16xbf16>, vector<16x128xbf16>, vector<8x128xf32> -> vector<8x128xf32>
    %c0_3 = arith.constant 0 : index
    %c0_4 = arith.constant 0 : index
    %4 = vector.load %arg3[%c0_3, %c0_4] : memref<1x128xf32, #tpu.memory_space<vmem>>, vector<1x128xf32>
    %5 = vector.broadcast %4 : vector<1x128xf32> to vector<8x128xf32>
    %6 = arith.addf %3, %5 : vector<8x128xf32>
    %cst_5 = arith.constant 0.000000e+00 : f32
    %7 = vector.broadcast %cst_5 : f32 to vector<8x128xf32>
    %8 = arith.maximumf %6, %7 : vector<8x128xf32>
    %9 = arith.truncf %8 : vector<8x128xf32> to vector<8x128xbf16>
    %c0_6 = arith.constant 0 : index
    %c0_7 = arith.constant 0 : index
    %10 = vector.load %arg7[%c0_6, %c0_7] : memref<8x128xbf16, #tpu.memory_space<vmem>>, vector<8x128xbf16>
    tpu.vector_store %arg7[%c0_6, %c0_7], %9 {strides = array<i32>} : memref<8x128xbf16, #tpu.memory_space<vmem>>, vector<8x128xbf16>,
    %11 = arith.truncf %8 : vector<8x128xf32> to vector<8x128xbf16>
    %c0_8 = arith.constant 0 : index
    %c0_9 = arith.constant 0 : index
    %12 = vector.load %arg4[%c0_8, %c0_9] : memref<128x128xbf16, #tpu.memory_space<vmem>>, vector<128x128xbf16>
    %cst_10 = arith.constant dense<0.000000e+00> : vector<8x128xf32>
    %13 = tpu.matmul %11, %12, %cst_10 {dimension_numbers = #tpu.dot_dimension_numbers<[1], [0], [0], [1], [0, 0, 1, 1], [], []>} : vector<8x128xbf16>, vector<128x128xbf16>, vector<8x128xf32> -> vector<8x128xf32>
    %c0_11 = arith.constant 0 : index
    %c0_12 = arith.constant 0 : index
    %14 = vector.load %arg5[%c0_11, %c0_12] : memref<1x128xf32, #tpu.memory_space<vmem>>, vector<1x128xf32>
    %15 = vector.broadcast %14 : vector<1x128xf32> to vector<8x128xf32>
    %16 = arith.addf %13, %15 : vector<8x128xf32>
    %c0_13 = arith.constant 0 : index
    %c0_14 = arith.constant 0 : index
    %17 = vector.load %arg6[%c0_13, %c0_14] : memref<8x128xf32, #tpu.memory_space<vmem>>, vector<8x128xf32>
    tpu.vector_store %arg6[%c0_13, %c0_14], %16 {strides = array<i32>} : memref<8x128xf32, #tpu.memory_space<vmem>>, vector<8x128xf32>,
    return
  }
  func.func @transform_0(%arg0: i32) -> (i32, i32) {
    %c0_i32 = arith.constant 0 : i32
    %c0_i32_0 = arith.constant 0 : i32
    return %arg0, %c0_i32 : i32, i32
  }
  func.func @transform_1(%arg0: i32) -> (i32, i32) {
    %c0_i32 = arith.constant 0 : i32
    %c0_i32_0 = arith.constant 0 : i32
    %c0_i32_1 = arith.constant 0 : i32
    return %c0_i32, %c0_i32_0 : i32, i32
  }
  func.func @transform_2(%arg0: i32) -> (i32, i32) {
    %c0_i32 = arith.constant 0 : i32
    %c0_i32_0 = arith.constant 0 : i32
    %c0_i32_1 = arith.constant 0 : i32
    return %c0_i32, %c0_i32_0 : i32, i32
  }
  func.func @transform_3(%arg0: i32) -> (i32, i32) {
    %c0_i32 = arith.constant 0 : i32
    %c0_i32_0 = arith.constant 0 : i32
    %c0_i32_1 = arith.constant 0 : i32
    return %c0_i32, %c0_i32_0 : i32, i32
  }
  func.func @transform_4(%arg0: i32) -> (i32, i32) {
    %c0_i32 = arith.constant 0 : i32
    %c0_i32_0 = arith.constant 0 : i32
    %c0_i32_1 = arith.constant 0 : i32
    return %c0_i32, %c0_i32_0 : i32, i32
  }
  func.func @transform_5(%arg0: i32) -> (i32, i32) {
    %c0_i32 = arith.constant 0 : i32
    %c0_i32_0 = arith.constant 0 : i32
    return %arg0, %c0_i32 : i32, i32
  }
  func.func @transform_6(%arg0: i32) -> (i32, i32) {
    %c0_i32 = arith.constant 0 : i32
    %c0_i32_0 = arith.constant 0 : i32
    return %arg0, %c0_i32 : i32, i32
  }
}

</mosaic_0001>

<bundles_post_ra>
// kernel: tpu_custom_call.1
= control target key start
LH: loop header
LB: loop body
LE: loop exit
PB: predicated region body
PF: predicated region fallthrough
CT: control target
= control target key end

     0   :  { %12 = vsyncpa [#allocation3], 0  ;;  %s571_s0 = inlined_call_operand.hbm [shape: f32[8,16], index: 0, kind: input, shape index: {}]   ;;  %s572_s1 = inlined_call_operand.hbm [shape: bf16[16,128], index: 1, kind: input, shape index: {}]   ;;  %s573_s2 = inlined_call_operand.vmem [shape: f32[1,128], index: 2, kind: input, shape index: {}]   ;;  %s574_s3 = inlined_call_operand.hbm [shape: bf16[128,128], index: 3, kind: input, shape index: {}]   ;;  %s575_s4 = inlined_call_operand.vmem [shape: f32[1,128], index: 4, kind: input, shape index: {}]   ;;  %s576_s5 = inlined_call_operand.hbm [shape: f32[8,128], index: 5, kind: output, shape index: {0}]   ;;  %s577_s6 = inlined_call_operand.hbm [shape: bf16[8,128], index: 6, kind: output, shape index: {1}]  }
   0x1   :  { %13 = vsyncpa [#allocation6], 0 }
   0x2   :  { %14 = vsyncpa [#allocation4], 0 }
   0x3   :  { %15 = vsyncpa [#allocation10], 0  ;;  %s455_s21 = smov [#allocation5]   ;;  %s337_s25 = scalar_lea.hbm %s572_s1, 128 }
   0x4   :  { %s31_s22 = sshll.u32 %s455_s21, 4  ;;  %p338_p0 = scmp.ne.s32.totalorder %s572_s1, %s337_s25  ;;  %s32_s22 = int_to_ptr.vmem [resolvable:$true] %s31_s22 }
   0x5   :  { %p341_p1 = scmp.lt.u32.totalorder %s337_s25, %s572_s1 }
   0x7   :  { %p343_p2 = pnand %p341_p1, %p338_p0 }
   0x9   :  { %346 = shalt.err (!%p343_p2)
}
   0xa   :  { %s347_s30 = scalar_lea.vmem %s32_s22, 128  ;;  %p352_p4 = scmp.lt.s32.totalorder %s32_s22, %s32_s22 }
   0xb   :  { %p348_p3 = scmp.ne.s32.totalorder %s32_s22, %s347_s30  ;;  %p353_p5 = scmp.lt.s32.totalorder %s347_s30, %s347_s30 }
   0xd   :  { %p354_p6 = por %p353_p5, %p352_p4 }
   0xf   :  { %p355_p7 = pnand %p354_p6, %p348_p3 }
  0x11   :  { %358 = shalt.err (!%p355_p7)
}
  0x12   :  { %s456_s7 = smov 64   ;;  %s457_s8 = smov 4  }
  0x13   :  { %37 = dma.hbm_to_vmem [thread:$0]  %s572_s1, 128, %s32_s22, [#allocation6], %s456_s7, %s456_s7, %s457_s8  }
  0x14   :  { %s458_s11 = smov [#allocation2]   ;;  %s459_s13 = smov [#allocation7]  }
  0x15   :  { %s22_s12 = sshll.u32 %s458_s11, 4  ;;  %s45_s14 = sshll.u32 %s459_s13, 4  ;;  %s23_s12 = int_to_ptr.vmem [resolvable:$true] %s22_s12  ;;  %s46_s14 = int_to_ptr.vmem [resolvable:$true] %s45_s14 }
  0x16   :  { %s359_s17 = scalar_lea.hbm %s571_s0, 128 }
  0x17   :  { %p360_p8 = scmp.ne.s32.totalorder %s571_s0, %s359_s17  ;;  %p363_p9 = scmp.lt.u32.totalorder %s359_s17, %s571_s0 }
  0x19   :  { %p365_p10 = pnand %p363_p9, %p360_p8 }
  0x1b   :  { %368 = shalt.err (!%p365_p10)
}
  0x1c   :  { %s369_s1 = scalar_lea.vmem %s23_s12, 128  ;;  %p374_p12 = scmp.lt.s32.totalorder %s23_s12, %s23_s12 }
  0x1d   :  { %p370_p11 = scmp.ne.s32.totalorder %s23_s12, %s369_s1  ;;  %p375_p13 = scmp.lt.s32.totalorder %s369_s1, %s369_s1 }
  0x1f   :  { %p376_p0 = por %p375_p13, %p374_p12 }
  0x21   :  { %p377_p1 = pnand %p376_p0, %p370_p11 }
  0x23   :  { %380 = shalt.err (!%p377_p1)
}
  0x24   :  { %25 = dma.hbm_to_vmem [thread:$0]  %s571_s0, 128, %s23_s12, [#allocation3]  }
  0x25   :  { %s381_s26 = scalar_lea.hbm %s574_s3, 1024 }
  0x26   :  { %p382_p2 = scmp.ne.s32.totalorder %s574_s3, %s381_s26  ;;  %p385_p3 = scmp.lt.u32.totalorder %s381_s26, %s574_s3 }
  0x28   :  { %p387_p4 = pnand %p385_p3, %p382_p2 }
  0x2a   :  { %390 = shalt.err (!%p387_p4)
}
  0x2b   :  { %s391_s9 = scalar_lea.vmem %s46_s14, 1024  ;;  %p396_p6 = scmp.lt.s32.totalorder %s46_s14, %s46_s14 }
  0x2c   :  { %p392_p5 = scmp.ne.s32.totalorder %s46_s14, %s391_s9  ;;  %p397_p7 = scmp.lt.s32.totalorder %s391_s9, %s391_s9 }
  0x2e   :  { %p398_p8 = por %p397_p7, %p396_p6 }
  0x30   :  { %p399_p9 = pnand %p398_p8, %p392_p5 }
  0x32   :  { %402 = shalt.err (!%p399_p9)
}
  0x33   :  { %51 = dma.hbm_to_vmem [thread:$0]  %s574_s3, 1024, %s46_s14, [#allocation6], %s456_s7, %s456_s7, %s457_s8  }
  0x34   :  { %447 = dma.done.wait [#allocation3], 128  }
  0x35   :  { %448 = vsyncadd [#allocation3], 4294967168 }
  0x36   :  { %449 = dma.done.wait [#allocation6], 1152  }
  0x37   :  { %450 = vsyncadd [#allocation6], 4294966144  ;;  %v460_v0 = vmov 0.0   ;;  %vm461_vm0 = vmmov 0   ;;  %v328_v1 = vld [vmem:[#allocation5] sm:$0xff]   ;;  %v64_v2 = vld [vmem:[#allocation2] sm:$0xff] }
  0x38   :  { %293 = vmatprep.subr.bf16.mxu0 %v460_v0  ;;  %295 = vmatprep.mubr.msk.bf16.mxu0 %vm461_vm0, %v460_v0  ;;  %v65_v3 = vpack.c.bf16 %v64_v2, %v64_v2  ;;  %vm81_vm1 = vcmask 130048   ;;  %v329_v4 = vld [vmem:[#allocation7] sm:$0xff]   ;;  %v330_v5 = vld [vmem:[#allocation7 + $0x8] sm:$0xff]   ;;  %v331_v6 = vld [vmem:[#allocation7 + $0x10] sm:$0xff]   ;;  %s462_s8 = smov [#allocation9]  }
  0x39   :  { %299 = vmatprep.subr.bf16.mxu1 %v460_v0  ;;  %315 = vmatprep.mubr.msk.bf16.mxu1 %vm461_vm0, %v460_v0  ;;  %v332_v7 = vld [vmem:[#allocation7 + $0x18] sm:$0xff]   ;;  %v333_v8 = vld [vmem:[#allocation7 + $0x20] sm:$0xff]   ;;  %v334_v9 = vld [vmem:[#allocation7 + $0x28] sm:$0xff]   ;;  %s256_s11 = sshll.u32 %s462_s8, 4  ;;  %s257_s11 = int_to_ptr.vmem [resolvable:$true] %s256_s11 }
  0x3a   :  { %294 = vmatpush3.bf16.msra.mxu0 %v328_v1  ;;  %300 = vmatpush3.bf16.msra.mxu1 %v329_v4  ;;  %v335_v10 = vld [vmem:[#allocation7 + $0x30] sm:$0xff]   ;;  %v336_v11 = vld [vmem:[#allocation7 + $0x38] sm:$0xff]   ;;  %s403_s12 = scalar_lea.vmem %s257_s11, 64  ;;  %p408_p11 = scmp.lt.s32.totalorder %s257_s11, %s257_s11 }
  0x3b   :  { %301 = vmatprep.subr.bf16.mxu1 %v460_v0  ;;  %v270_v12 = vld [vmem:[%s573_s2] ss:$0 sm:$0xff]  ;;  %p404_p10 = scmp.ne.s32.totalorder %s257_s11, %s403_s12  ;;  %p409_p12 = scmp.lt.s32.totalorder %s403_s12, %s403_s12 }
  0x3d   :  { %296 = vmatmul.mubr.msk.bf16.vlgmr.msra.gmra.mrb[0].mxu0 %vm81_vm1, %v65_v3  ;;  %p410_p13 = por %p409_p12, %p408_p11 }
  0x3e   :  { %302 = vmatpush3.bf16.msra.mxu1 %v330_v5 }
  0x3f   :  { %303 = vmatprep.subr.bf16.mxu1 %v460_v0  ;;  %p411_p0 = pnand %p410_p13, %p404_p10 }
  0x42   :  { %304 = vmatpush3.bf16.msra.mxu1 %v331_v6 }
  0x43   :  { %305 = vmatprep.subr.bf16.mxu1 %v460_v0 }
  0x46   :  { %306 = vmatpush3.bf16.msra.mxu1 %v332_v7 }
  0x47   :  { %307 = vmatprep.subr.bf16.mxu1 %v460_v0 }
  0x4a   :  { %308 = vmatpush3.bf16.msra.mxu1 %v333_v8 }
  0x4b   :  { %309 = vmatprep.subr.bf16.mxu1 %v460_v0 }
  0x4e   :  { %310 = vmatpush3.bf16.msra.mxu1 %v334_v9 }
  0x4f   :  { %311 = vmatprep.subr.bf16.mxu1 %v460_v0 }
  0x52   :  { %312 = vmatpush3.bf16.msra.mxu1 %v335_v10 }
  0x53   :  { %313 = vmatprep.subr.bf16.mxu1 %v460_v0 }
  0x56   :  { %314 = vmatpush3.bf16.msra.mxu1 %v336_v11 }
 0x110   :  { %v119_v13 = vpop.f32.mrb[0].mxu0 }
 0x111   :  { %v120_v14 = vadd.f32 %v270_v12, %v119_v13  ;;  %v297_v15 = vpop.f32.mrb[1].mxu0 }
 0x112   :  { %v122_v16 = vpop.f32.mrb[2].mxu0 }
 0x113   :  { %v125_v17 = vmax.f32 %v120_v14, 0.0  ;;  %v298_v18 = vpop.f32.mrb[3].mxu0 }
 0x115   :  { %v126_v19 = vpack.c.bf16 %v125_v17, %v125_v17 }
 0x117   :  { %127 = vst [vmem:[#allocation9] sm:$0xf] %v126_v19  ;;  %316 = vmatmul.mubr.bf16.vlgmr.msra.gmra.mrb[0].mxu1 %v126_v19 }
 0x118   :  { %414 = shalt.err (!%p411_p0)
}
 0x119   :  { %s415_s14 = scalar_lea.hbm %s577_s6, 64 }
 0x11a   :  { %p416_p1 = scmp.ne.s32.totalorder %s577_s6, %s415_s14  ;;  %p419_p2 = scmp.lt.u32.totalorder %s415_s14, %s577_s6 }
 0x11c   :  { %p421_p3 = pnand %p419_p2, %p416_p1 }
 0x11e   :  { %424 = shalt.err (!%p421_p3)
}
 0x11f   :  { %259 = dma.vmem_to_hbm [thread:$0]  %s257_s11, 64, %s577_s6, [#allocation10]   ;;  %v273_v20 = vld [vmem:[%s575_s4] ss:$0 sm:$0xff] }
 0x120   :  { %s463_s22 = smov [#allocation8]  }
 0x121   :  { %s246_s23 = sshll.u32 %s463_s22, 4  ;;  %s247_s23 = int_to_ptr.vmem [resolvable:$true] %s246_s23 }
 0x122   :  { %s425_s24 = scalar_lea.vmem %s247_s23, 128  ;;  %p430_p5 = scmp.lt.s32.totalorder %s247_s23, %s247_s23 }
 0x123   :  { %p426_p4 = scmp.ne.s32.totalorder %s247_s23, %s425_s24  ;;  %p431_p6 = scmp.lt.s32.totalorder %s425_s24, %s425_s24 }
 0x125   :  { %p432_p7 = por %p431_p6, %p430_p5 }
 0x127   :  { %p433_p8 = pnand %p432_p7, %p426_p4 }
 0x1ea   :  { %v233_v21 = vpop.f32.mrb[0].mxu1 }
 0x1eb   :  { %v234_v22 = vadd.f32 %v273_v20, %v233_v21  ;;  %v317_v23 = vpop.f32.mrb[1].mxu1 }
 0x1ec   :  { %v236_v24 = vpop.f32.mrb[2].mxu1 }
 0x1ed   :  { %239 = vst [vmem:[#allocation8] sm:$0xff] %v234_v22  ;;  %v318_v25 = vpop.f32.mrb[3].mxu1 }
 0x1ee   :  { %436 = shalt.err (!%p433_p8)
}
 0x1ef   :  { %s437_s4 = scalar_lea.hbm %s576_s5, 128 }
 0x1f0   :  { %p438_p9 = scmp.ne.s32.totalorder %s576_s5, %s437_s4  ;;  %p441_p10 = scmp.lt.u32.totalorder %s437_s4, %s576_s5 }
 0x1f2   :  { %p443_p11 = pnand %p441_p10, %p438_p9 }
 0x1f4   :  { %446 = shalt.err (!%p443_p11)
}
 0x1f5   :  { %249 = dma.vmem_to_hbm [thread:$0]  %s247_s23, 128, %s576_s5, [#allocation4]  }
 0x1f6   :  { %451 = dma.done.wait [#allocation4], 128  }
 0x1f7   :  { %452 = vsyncadd [#allocation4], 4294967168 }
 0x1f8   :  { %453 = dma.done.wait [#allocation10], 64  }
 0x1f9   :  { %454 = vsyncadd [#allocation10], 4294967232 }
 0x1fa   :  { %266 = vsyncpa [#allocation3], 1 }
 0x1fb   :  { %267 = vsyncpa [#allocation6], 1 }
 0x1fc   :  { %268 = vsyncpa [#allocation4], 1 }
 0x1fd   :  { %269 = vsyncpa [#allocation10], 1 }

</bundles_post_ra>
